<compile_context>
chip_gen: v6e
topology: v6e:2x2x1
jax: 0.10.0
libtpu: 0.0.40
codegen_flags: <defaults>
</compile_context>

<pallas_src>
import numpy as np
import jax
import jax.numpy as jnp
from jax import lax
from jax.experimental import pallas as pl
from jax.experimental.pallas import tpu as pltpu


def _round_up(x, m):
    return ((x + m - 1) // m) * m


def _vmem_plan():
    """Returns (tile-search budget, vmem_limit_bytes, target matmul-M) per generation."""
    cap = None
    try:
        cap = getattr(pltpu.get_tpu_info(), "vmem_capacity_bytes", None)
    except Exception:
        cap = None
    if cap is None:
        cap = 64 * 2**20                       # assume smallest (v7x per-TC) if unknown
    if cap >= 100 * 2**20:                     # v5e / v6e: 128 MiB VMEM
        return 64 * 2**20, 96 * 2**20, 1024
    return 28 * 2**20, 48 * 2**20, 512         # v7x: 64 MiB per TensorCore


def _dwconv_kernel(x_ref, w_ref, shift_ref, o_ref):
    # x_ref:     (1, h_blk, Wp, 6C)      bf16   stacked space-to-depth phases
    # w_ref:     (6C, 2*Co_p)            bf16   [W_main | W_shift], BN scale folded in
    # shift_ref: (1, Co_p)               f32    folded BN shift
    # o_ref:     (1, h_blk, w_out, Co_p) bf16
    _, h_blk, wp, ck = x_ref.shape
    _, _, w_out, co_p = o_ref.shape

    x = x_ref[0]                                          # (h_blk, Wp, 6C) bf16
    xf = x.reshape(h_blk * wp, ck)                        # pure view: Wp % 16 == 0
    # One MXU matmul (bf16 x bf16 -> f32 acc): left half = kw=0/1 taps, right half = kw=2 taps.
    z2 = jnp.dot(xf, w_ref[...], preferred_element_type=jnp.float32)
    z2 = z2.reshape(h_blk, wp, 2 * co_p)                  # view: Wp % 8 == 0

    z = (z2[:, :w_out, :co_p]                             # unshifted contribution at column j
         + z2[:, 1:1 + w_out, co_p:]                      # kw=2 contribution lives at column j+1
         + shift_ref[...].reshape(1, 1, co_p))            # folded BN shift (scale is in W)
    o_ref[0] = jnp.maximum(z, 0.0).astype(o_ref.dtype)    # ReLU, bf16 lane-dense store


def dwconv_forward(x_nchw, dw_w, pw_w, gamma, beta, run_mean, run_var, *,
                   stride=2, padding=1, eps=1e-5, out_dtype=jnp.float32):
    """x_nchw: (N, C, H, W); dw_w: (C, 3, 3); pw_w: (Co, C)."""
    assert stride == 2 and padding == 1, "kernel specialized to k=3, s=2, p=1"
    n, c, h, w = x_nchw.shape
    c_out = pw_w.shape[0]
    h_out = (h + 2 * padding - 3) // stride + 1
    w_out = (w + 2 * padding - 3) // stride + 1
    co_p = _round_up(c_out, 128)                 # lane-dense output / matmul N dim
    wp = _round_up(w_out + 1, 16)                # bf16-aligned plane width (reshape is a view)
    ck = 6 * c                                   # stacked phase channels

    budget, vmem_limit, target_m = _vmem_plan()

    def vmem_est(hb):
        ck_pad = _round_up(ck, 128)
        in_slab = hb * wp * ck_pad * 2                            # bf16 stacked planes
        out_slab = hb * _round_up(w_out, 16) * co_p * 2           # bf16 output
        z2 = hb * wp * 2 * co_p * 4                               # f32 matmul result
        zshift = hb * _round_up(w_out, 8) * co_p * 4              # realigned slice copy
        w_bytes = _round_up(ck, 16) * 2 * co_p * 2 + 8 * co_p * 4
        return 2 * (in_slab + out_slab) + z2 + zshift + 2 * w_bytes

    # ---- row-block size: target M = h_blk*Wp, bounded by VMEM, avoid padded-row waste ----
    target_rows = min(h_out, max(1, target_m // wp))
    if n == 1 and h_out > 1:
        target_rows = min(target_rows, (h_out + 1) // 2)   # >= 2 grid blocks for v7x megacore
    best, h_blk = None, 1
    for hb in range(1, target_rows + 1):
        if vmem_est(hb) > budget:
            break                                            # monotonic in hb
        # cost model: padded rows of work + ~2-row-equivalent fixed per-step overhead
        cost = pl.cdiv(h_out, hb) * (hb + 2)
        if best is None or cost < best or (cost == best and hb > h_blk):
            best, h_blk = cost, hb
    n_blk = pl.cdiv(h_out, h_blk)
    h_pad = n_blk * h_blk

    # ---- wrapper glue (plain JAX): NHWC, pad, stacked space-to-depth phases ----
    x_nhwc = jnp.transpose(x_nchw, (0, 2, 3, 1)).astype(jnp.bfloat16)
    hp_in = 2 * h_out + 1
    wp_in = 2 * (w_out + 1)
    x_p = jnp.pad(x_nhwc, ((0, 0),
                           (padding, hp_in - padding - h),
                           (padding, wp_in - padding - w),
                           (0, 0)))
    x_p = x_p.reshape(n, hp_in, w_out + 1, 2, c)             # split cols into (j, col-phase b)
    phases = [x_p[:, kh:kh + 2 * h_out:2, :, b, :]            # (N, h_out, w_out+1, C)
              for b in range(2) for kh in range(3)]
    stk = jnp.concatenate(phases, axis=-1)                    # (N, h_out, w_out+1, 6C)
    stk = jnp.pad(stk, ((0, 0), (0, h_pad - h_out), (0, wp - (w_out + 1)), (0, 0)))

    # ---- fold depthwise taps + pointwise + BN scale into one bf16 weight matrix ----
    f32 = jnp.float32
    dw = dw_w.astype(f32)                                     # (C, 3, 3)
    scale = gamma.astype(f32) / jnp.sqrt(run_var.astype(f32) + eps)
    shift = beta.astype(f32) - run_mean.astype(f32) * scale
    pw_s = (pw_w.astype(f32) * scale[:, None]).T              # (C, Co), BN scale folded in
    wm, ws = [], []
    for b in range(2):
        for kh in range(3):
            wm.append(dw[:, kh, b][:, None] * pw_s)                       # kw = b   (unshifted)
            ws.append(dw[:, kh, 2][:, None] * pw_s if b == 0
                      else jnp.zeros((c, c_out), f32))                    # kw = 2   (shifted)
    pad_o = ((0, 0), (0, co_p - c_out))
    w_main = jnp.pad(jnp.concatenate(wm, axis=0), pad_o)      # (6C, Co_p)
    w_shift = jnp.pad(jnp.concatenate(ws, axis=0), pad_o)     # (6C, Co_p)
    w_cat = jnp.concatenate([w_main, w_shift], axis=1).astype(jnp.bfloat16)   # (6C, 2*Co_p)
    shift_row = jnp.pad(shift, (0, co_p - c_out)).reshape(1, co_p)

    # ---- pallas_call ----
    def build(weight_mode):
        wkw = {} if weight_mode is None else {"pipeline_mode": weight_mode}
        return pl.pallas_call(
            _dwconv_kernel,
            out_shape=jax.ShapeDtypeStruct((n, h_pad, w_out, co_p), jnp.bfloat16),
            grid_spec=pltpu.PrefetchScalarGridSpec(
                num_scalar_prefetch=0,
                grid=(n, n_blk),
                in_specs=[
                    pl.BlockSpec((1, h_blk, wp, ck), lambda b, r: (b, r, 0, 0)),
                    pl.BlockSpec((ck, 2 * co_p), lambda b, r: (0, 0), **wkw),
                    pl.BlockSpec((1, co_p), lambda b, r: (0, 0), **wkw),
                ],
                out_specs=pl.BlockSpec((1, h_blk, w_out, co_p),
                                       lambda b, r: (b, r, 0, 0)),
            ),
            compiler_params=pltpu.CompilerParams(
                dimension_semantics=("parallel", "parallel"),
                vmem_limit_bytes=vmem_limit),
        )

    try:
        # constant-index weights never get re-fetched -> single buffer saves VMEM
        out = build(pl.Buffered(1))(stk, w_cat, shift_row)
    except Exception:
        # pipeline_mode / Buffered(1) unsupported on this JAX build -> default buffering
        out = build(None)(stk, w_cat, shift_row)

    out = out[:, :h_out, :, :c_out]
    return jnp.transpose(out, (0, 3, 1, 2)).astype(out_dtype)   # back to NCHW (f32 by default)


def _reference(x_nchw, dw_w, pw_w, gamma, beta, run_mean, run_var, eps=1e-5):
    # Pure-JAX f32 reference (NHWC convs) for verification.
    c = x_nchw.shape[1]
    x = jnp.transpose(x_nchw, (0, 2, 3, 1)).astype(jnp.float32)
    dw_hwio = jnp.transpose(dw_w, (1, 2, 0))[:, :, None, :]            # (3,3,1,C)
    y = lax.conv_general_dilated(x, dw_hwio, window_strides=(2, 2),
                                 padding=[(1, 1), (1, 1)],
                                 dimension_numbers=("NHWC", "HWIO", "NHWC"),
                                 feature_group_count=c)
    z = jnp.einsum("nhwc,oc->nhwo", y, pw_w.astype(jnp.float32))
    scale = gamma / jnp.sqrt(run_var + eps)
    shift = beta - run_mean * scale
    z = jnp.maximum(z * scale + shift, 0.0)
    return jnp.transpose(z, (0, 3, 1, 2))


if __name__ == "__main__":
    key = jax.random.PRNGKey(0)
    k_x, k_dw, k_pw, k_g, k_b, k_m, k_v = jax.random.split(key, 7)

    N, C_in, H, W = 2, 4, 16, 16
    C_out = 8

    x = jax.random.normal(k_x, (N, C_in, H, W), jnp.float32)
    dw_w = jax.random.normal(k_dw, (C_in, 3, 3), jnp.float32) * 0.1      # depthwise (C,1,3,3) squeezed
    pw_w = jax.random.normal(k_pw, (C_out, C_in), jnp.float32) * 0.1     # pointwise (Co,C,1,1) squeezed
    gamma = 1.0 + 0.1 * jax.random.normal(k_g, (C_out,), jnp.float32)
    beta = 0.1 * jax.random.normal(k_b, (C_out,), jnp.float32)
    run_mean = 0.05 * jax.random.normal(k_m, (C_out,), jnp.float32)
    run_var = jnp.abs(jax.random.normal(k_v, (C_out,), jnp.float32)) + 0.5

    out = dwconv_forward(x, dw_w, pw_w, gamma, beta, run_mean, run_var)
    out = jax.block_until_ready(out)

    ref = _reference(x, dw_w, pw_w, gamma, beta, run_mean, run_var)
    assert out.shape == (N, C_out, H // 2, W // 2), out.shape
    # bf16 activations + bf16 folded weights on the MXU -> loose tolerance vs the f32 reference.
    err = float(np.max(np.abs(np.asarray(out) - np.asarray(ref))))
    assert np.allclose(np.asarray(out), np.asarray(ref), atol=2e-2, rtol=2e-2), err

    print("KERNEL_OK")
</pallas_src>

<mosaic_0001>
module attributes {stable_mosaic.version = 11 : i64} {
  func.func @_dwconv_kernel(%arg0: i32, %arg1: i32, %arg2: memref<1x8x16x24xbf16, #tpu.memory_space<vmem>>, %arg3: memref<24x256xbf16, #tpu.memory_space<vmem>>, %arg4: memref<1x128xf32, #tpu.memory_space<vmem>>, %arg5: memref<1x8x8x128xbf16, #tpu.memory_space<vmem>>) attributes {dimension_semantics = [#tpu.dimension_semantics<parallel>, #tpu.dimension_semantics<parallel>], iteration_bounds = array<i64: 2, 1>, scalar_prefetch = 0 : i64, scratch_operands = 0 : i64, tpu.core_type = #tpu.core_type<tc>, window_params = [{transform_indices = @transform_0, window_bounds = array<i64: 1, 8, 16, 24>}, {pipeline_mode = #tpu.pipeline_mode<synchronous>, transform_indices = @transform_1, window_bounds = array<i64: 24, 256>}, {pipeline_mode = #tpu.pipeline_mode<synchronous>, transform_indices = @transform_2, window_bounds = array<i64: 1, 128>}, {transform_indices = @transform_3, window_bounds = array<i64: 1, 8, 8, 128>}]} {
    %c0 = arith.constant 0 : index
    %c0_0 = arith.constant 0 : index
    %c0_1 = arith.constant 0 : index
    %c0_2 = arith.constant 0 : index
    %0 = vector.load %arg2[%c0, %c0_0, %c0_1, %c0_2] : memref<1x8x16x24xbf16, #tpu.memory_space<vmem>>, vector<1x8x16x24xbf16>
    %1 = vector.shape_cast %0 : vector<1x8x16x24xbf16> to vector<8x16x24xbf16>
    %2 = vector.shape_cast %1 : vector<8x16x24xbf16> to vector<128x24xbf16>
    %c0_3 = arith.constant 0 : index
    %c0_4 = arith.constant 0 : index
    %3 = vector.load %arg3[%c0_3, %c0_4] : memref<24x256xbf16, #tpu.memory_space<vmem>>, vector<24x256xbf16>
    %cst = arith.constant dense<0.000000e+00> : vector<128x256xf32>
    %4 = tpu.matmul %2, %3, %cst {dimension_numbers = #tpu.dot_dimension_numbers<[1], [0], [0], [1], [0, 0, 1, 1], [], []>} : vector<128x24xbf16>, vector<24x256xbf16>, vector<128x256xf32> -> vector<128x256xf32>
    %5 = vector.shape_cast %4 : vector<128x256xf32> to vector<8x16x256xf32>
    %6 = vector.extract_strided_slice %5 {offsets = [0, 0, 0], sizes = [8, 8, 128], strides = [1, 1, 1]} : vector<8x16x256xf32> to vector<8x8x128xf32>
    %7 = vector.extract_strided_slice %5 {offsets = [0, 1, 128], sizes = [8, 8, 128], strides = [1, 1, 1]} : vector<8x16x256xf32> to vector<8x8x128xf32>
    %8 = arith.addf %6, %7 : vector<8x8x128xf32>
    %c0_5 = arith.constant 0 : index
    %c0_6 = arith.constant 0 : index
    %9 = vector.load %arg4[%c0_5, %c0_6] : memref<1x128xf32, #tpu.memory_space<vmem>>, vector<1x128xf32>
    %10 = vector.shape_cast %9 : vector<1x128xf32> to vector<1x1x128xf32>
    %11 = vector.broadcast %10 : vector<1x1x128xf32> to vector<8x8x128xf32>
    %12 = arith.addf %8, %11 : vector<8x8x128xf32>
    %cst_7 = arith.constant 0.000000e+00 : f32
    %13 = vector.broadcast %cst_7 : f32 to vector<8x8x128xf32>
    %14 = arith.maximumf %12, %13 : vector<8x8x128xf32>
    %15 = arith.truncf %14 : vector<8x8x128xf32> to vector<8x8x128xbf16>
    %c0_8 = arith.constant 0 : index
    %c0_9 = arith.constant 0 : index
    %c0_10 = arith.constant 0 : index
    %c0_11 = arith.constant 0 : index
    %16 = vector.load %arg5[%c0_8, %c0_9, %c0_10, %c0_11] : memref<1x8x8x128xbf16, #tpu.memory_space<vmem>>, vector<1x8x8x128xbf16>
    %17 = vector.shape_cast %16 : vector<1x8x8x128xbf16> to vector<8x8x128xbf16>
    %18 = vector.shape_cast %15 : vector<8x8x128xbf16> to vector<1x8x8x128xbf16>
    tpu.vector_store %arg5[%c0_8, %c0_9, %c0_10, %c0_11], %18 {strides = array<i32>} : memref<1x8x8x128xbf16, #tpu.memory_space<vmem>>, vector<1x8x8x128xbf16>,
    return
  }
  func.func @transform_0(%arg0: i32, %arg1: i32) -> (i32, i32, i32, i32) {
    %c0_i32 = arith.constant 0 : i32
    %c0_i32_0 = arith.constant 0 : i32
    %c0_i32_1 = arith.constant 0 : i32
    return %arg0, %arg1, %c0_i32, %c0_i32_0 : i32, i32, i32, i32
  }
  func.func @transform_1(%arg0: i32, %arg1: i32) -> (i32, i32) {
    %c0_i32 = arith.constant 0 : i32
    %c0_i32_0 = arith.constant 0 : i32
    %c0_i32_1 = arith.constant 0 : i32
    return %c0_i32, %c0_i32_0 : i32, i32
  }
  func.func @transform_2(%arg0: i32, %arg1: i32) -> (i32, i32) {
    %c0_i32 = arith.constant 0 : i32
    %c0_i32_0 = arith.constant 0 : i32
    %c0_i32_1 = arith.constant 0 : i32
    return %c0_i32, %c0_i32_0 : i32, i32
  }
  func.func @transform_3(%arg0: i32, %arg1: i32) -> (i32, i32, i32, i32) {
    %c0_i32 = arith.constant 0 : i32
    %c0_i32_0 = arith.constant 0 : i32
    %c0_i32_1 = arith.constant 0 : i32
    return %arg0, %arg1, %c0_i32, %c0_i32_0 : i32, i32, i32, i32
  }
}

module attributes {stable_mosaic.version = 11 : i64} {
  func.func @_dwconv_kernel(%arg0: i32, %arg1: i32, %arg2: memref<1x8x16x24xbf16, #tpu.memory_space<vmem>>, %arg3: memref<24x256xbf16, #tpu.memory_space<vmem>>, %arg4: memref<1x128xf32, #tpu.memory_space<vmem>>, %arg5: memref<1x8x8x128xbf16, #tpu.memory_space<vmem>>) attributes {dimension_semantics = [#tpu.dimension_semantics<parallel>, #tpu.dimension_semantics<parallel>], iteration_bounds = array<i64: 2, 1>, scalar_prefetch = 0 : i64, scratch_operands = 0 : i64, tpu.core_type = #tpu.core_type<tc>, window_params = [{transform_indices = @transform_0, window_bounds = array<i64: 1, 8, 16, 24>}, {pipeline_mode = #tpu.pipeline_mode<synchronous>, transform_indices = @transform_1, window_bounds = array<i64: 24, 256>}, {pipeline_mode = #tpu.pipeline_mode<synchronous>, transform_indices = @transform_2, window_bounds = array<i64: 1, 128>}, {transform_indices = @transform_3, window_bounds = array<i64: 1, 8, 8, 128>}]} {
    %c0 = arith.constant 0 : index
    %c0_0 = arith.constant 0 : index
    %c0_1 = arith.constant 0 : index
    %c0_2 = arith.constant 0 : index
    %0 = vector.load %arg2[%c0, %c0_0, %c0_1, %c0_2] : memref<1x8x16x24xbf16, #tpu.memory_space<vmem>>, vector<1x8x16x24xbf16>
    %1 = vector.shape_cast %0 : vector<1x8x16x24xbf16> to vector<8x16x24xbf16>
    %2 = vector.shape_cast %1 : vector<8x16x24xbf16> to vector<128x24xbf16>
    %c0_3 = arith.constant 0 : index
    %c0_4 = arith.constant 0 : index
    %3 = vector.load %arg3[%c0_3, %c0_4] : memref<24x256xbf16, #tpu.memory_space<vmem>>, vector<24x256xbf16>
    %cst = arith.constant dense<0.000000e+00> : vector<128x256xf32>
    %4 = tpu.matmul %2, %3, %cst {dimension_numbers = #tpu.dot_dimension_numbers<[1], [0], [0], [1], [0, 0, 1, 1], [], []>} : vector<128x24xbf16>, vector<24x256xbf16>, vector<128x256xf32> -> vector<128x256xf32>
    %5 = vector.shape_cast %4 : vector<128x256xf32> to vector<8x16x256xf32>
    %6 = vector.extract_strided_slice %5 {offsets = [0, 0, 0], sizes = [8, 8, 128], strides = [1, 1, 1]} : vector<8x16x256xf32> to vector<8x8x128xf32>
    %7 = vector.extract_strided_slice %5 {offsets = [0, 1, 128], sizes = [8, 8, 128], strides = [1, 1, 1]} : vector<8x16x256xf32> to vector<8x8x128xf32>
    %8 = arith.addf %6, %7 : vector<8x8x128xf32>
    %c0_5 = arith.constant 0 : index
    %c0_6 = arith.constant 0 : index
    %9 = vector.load %arg4[%c0_5, %c0_6] : memref<1x128xf32, #tpu.memory_space<vmem>>, vector<1x128xf32>
    %10 = vector.shape_cast %9 : vector<1x128xf32> to vector<1x1x128xf32>
    %11 = vector.broadcast %10 : vector<1x1x128xf32> to vector<8x8x128xf32>
    %12 = arith.addf %8, %11 : vector<8x8x128xf32>
    %cst_7 = arith.constant 0.000000e+00 : f32
    %13 = vector.broadcast %cst_7 : f32 to vector<8x8x128xf32>
    %14 = arith.maximumf %12, %13 : vector<8x8x128xf32>
    %15 = arith.truncf %14 : vector<8x8x128xf32> to vector<8x8x128xbf16>
    %c0_8 = arith.constant 0 : index
    %c0_9 = arith.constant 0 : index
    %c0_10 = arith.constant 0 : index
    %c0_11 = arith.constant 0 : index
    %16 = vector.load %arg5[%c0_8, %c0_9, %c0_10, %c0_11] : memref<1x8x8x128xbf16, #tpu.memory_space<vmem>>, vector<1x8x8x128xbf16>
    %17 = vector.shape_cast %16 : vector<1x8x8x128xbf16> to vector<8x8x128xbf16>
    %18 = vector.shape_cast %15 : vector<8x8x128xbf16> to vector<1x8x8x128xbf16>
    tpu.vector_store %arg5[%c0_8, %c0_9, %c0_10, %c0_11], %18 {strides = array<i32>} : memref<1x8x8x128xbf16, #tpu.memory_space<vmem>>, vector<1x8x8x128xbf16>,
    return
  }
  func.func @transform_0(%arg0: i32, %arg1: i32) -> (i32, i32, i32, i32) {
    %c0_i32 = arith.constant 0 : i32
    %c0_i32_0 = arith.constant 0 : i32
    %c0_i32_1 = arith.constant 0 : i32
    return %arg0, %arg1, %c0_i32, %c0_i32_0 : i32, i32, i32, i32
  }
  func.func @transform_1(%arg0: i32, %arg1: i32) -> (i32, i32) {
    %c0_i32 = arith.constant 0 : i32
    %c0_i32_0 = arith.constant 0 : i32
    %c0_i32_1 = arith.constant 0 : i32
    return %c0_i32, %c0_i32_0 : i32, i32
  }
  func.func @transform_2(%arg0: i32, %arg1: i32) -> (i32, i32) {
    %c0_i32 = arith.constant 0 : i32
    %c0_i32_0 = arith.constant 0 : i32
    %c0_i32_1 = arith.constant 0 : i32
    return %c0_i32, %c0_i32_0 : i32, i32
  }
  func.func @transform_3(%arg0: i32, %arg1: i32) -> (i32, i32, i32, i32) {
    %c0_i32 = arith.constant 0 : i32
    %c0_i32_0 = arith.constant 0 : i32
    %c0_i32_1 = arith.constant 0 : i32
    return %arg0, %arg1, %c0_i32, %c0_i32_0 : i32, i32, i32, i32
  }
}

</mosaic_0001>

<bundles_post_ra>
// kernel: tpu_custom_call.1
= control target key start
LH: loop header
LB: loop body
LE: loop exit
PB: predicated region body
PF: predicated region fallthrough
CT: control target
= control target key end

     0   :  { %8 = vsyncpa [#allocation3], 0  ;;  %s1195_s0 = inlined_call_operand.hbm [shape: bf16[2,8,16,24], index: 0, kind: input, shape index: {}]   ;;  %s1196_s1 = inlined_call_operand.hbm [shape: bf16[24,256], index: 1, kind: input, shape index: {}]   ;;  %s1197_s2 = inlined_call_operand.vmem [shape: f32[1,128], index: 2, kind: input, shape index: {}]   ;;  %s1198_s3 = inlined_call_operand.hbm [shape: bf16[2,8,8,128], index: 3, kind: output, shape index: {}]  }
   0x1   :  { %10 = vsyncpa [#allocation3 + $0x1], 0 }
   0x2   :  { %11 = vsyncpa [#allocation6], 0 }
   0x3   :  { %12 = vsyncpa [#allocation4], 0 }
   0x4   :  { %14 = vsyncpa [#allocation4 + $0x1], 0  ;;  %s977_s12 = smov 0   ;;  %s979_s13 = smov 0  }
   0x5   :  { %s981_s14 = smov 0   ;;  %s983_s15 = smov 0  }
   0x6   :  { %s985_s16 = smov 0   ;;  %s987_s17 = smov 0  }
   0x7 LB: > { %s646_s18 = sadd.s32 4294967295, %s945_s17   ;;  %s647_s19 = sadd.s32 4294967294, %s945_s17   ;;  %s945_s17 = sphi %s987_s17, %s20_s17   ;;  %s941_s16 = sphi %s985_s16, %s1216_s16   ;;  %s937_s15 = sphi %s983_s15, %s1215_s15   ;;  %s933_s14 = sphi %s981_s14, %s1214_s14   ;;  %s929_s13 = sphi %s979_s13, %s1213_s13   ;;  %s925_s12 = sphi %s977_s12, %s1212_s12  }
   0x8   : > { %p54_p0 = scmp.ne.s32.totalorder %s929_s13, %s925_s12  ;;  %p1011_p1 = scmp.eq.s32.totalorder %s646_s18, 0 }
   0x9   : > { %p1015_p2 = scmp.eq.s32.totalorder %s646_s18, 1  ;;  %p128_p3 = scmp.eq.s32.totalorder %s647_s19, 1 }
   0xa   : > { %p1021_p4 = por %p1011_p1, %p54_p0  ;;  %p648_p5 = scmp.ge.s32.totalorder %s945_s17, 1 }
   0xb   : > { %p1026_p6 = por %p128_p3, %p54_p0  ;;  %p135_p7 = scmp.lt.s32.totalorder %s945_s17, 3 }
   0xc   : > { %s1202_s22 = scalar_select %p1021_p4, 1, 0 }
   0xd   : > { %s1203_s23 = scalar_select %p1026_p6, 1, 0 }
   0xe   : > { %p1031_p8 = pnand %p648_p5, %p135_p7  ;;  %s947_s25 = smov [#allocation5]  }
   0xf   : > { %s147_s26 = sshll.u32 %s947_s25, 4  ;;  %s32_s28 = sadd.s32 1, %s941_s16  ;;  %s148_s26 = int_to_ptr.vmem [resolvable:$true] %s147_s26 }
  0x10   : > { %p722_p9 = pneg %p1031_p8  ;;  %s818_s29 = scalar_lea.vmem %s148_s26, 384 }
  0x11   : > { %p819_p13 = scmp.ne.s32.totalorder %s148_s26, %s818_s29  ;;  %p826_p5 = scmp.lt.s32.totalorder %s148_s26, %s148_s26 }
  0x12   : > { %p1040_p11 = pnand %p722_p9, %p1011_p1  ;;  %p827_p7 = scmp.lt.s32.totalorder %s818_s29, %s818_s29 }
  0x14   : > { %p809_p12 = pneg %p1040_p11  ;;  %p828_p6 = por %p827_p7, %p826_p5 }
  0x16   : > { %p821_p0 = pnand %p819_p13, %p809_p12 }
  0x18   : > { %p822_p3 = pneg %p821_p0 }
  0x1a   : > { %p829_p4 = pnand %p828_p6, %p822_p3 }
  0x1c   : > { %832 = shalt.err (!%p829_p4)
}
  0x1d   : > { %s948_s30 = smov 128   ;;  %s949_s4 = smov 8  }
  0x1e   : > { %725 = dma.hbm_to_vmem [thread:$0]  (!%p1040_p11), %s1196_s1, 384, %s148_s26, [#allocation6], %s948_s30, %s948_s30, %s949_s4  }
  0x1f   : > { %p34_p6 = scmp.ge.s32.totalorder %s32_s28, 2  ;;  %s41_s7 = sadd.s32 1, %s933_s14 }
  0x20   : > { %p48_p4 = scmp.ne.s32.totalorder %s933_s14, %s929_s13  ;;  %p49_p9 = scmp.eq.s32.totalorder %s945_s17, 0 }
  0x21   : > { %s1218_s28 = smov (%p34_p6, %s32_s28), 0  ;;  %p735_p0 = scmp.lt.s32.totalorder %s945_s17, 2 }
  0x22   : > { %p1058_p12 = por %p49_p9, %p48_p4  ;;  %p1064_p13 = por %p1015_p2, %p48_p4 }
  0x23   : > { %s36_s10 = ssub.s32 %s941_s16, %s1218_s28  ;;  %s164_s11 = sand.u32 1, %s933_s14  }
  0x24   : > { %p39_p11 = scmp.eq.s32.totalorder %s36_s10, 0  ;;  %s651_s18 = sshll.u32 %s164_s11, 6 }
  0x25   : > { %s685_s25 = sshll.u32 %s941_s16, 10  ;;  %s168_s30 = scalar_lea.vmem [#allocation2], %s651_s18 }
  0x26   : > { %s1073_s19 = scalar_select %p39_p11, %s933_s14, %s41_s7  }
  0x27   : > { %s177_s29 = scalar_lea.hbm %s1195_s0, %s685_s25  ;;  %s178_s4 = sshll.u32 %s168_s30, 4  ;;  %s179_s4 = int_to_ptr.vmem [resolvable:$true] %s178_s4 }
  0x28   : > { %p1081_p2 = pnand %p735_p0, %p1058_p12  ;;  %s165_s5 = scalar_lea.sflag [#allocation3], %s164_s11 }
  0x29   : > { %s846_s6 = scalar_lea.vmem %s179_s4, 1024  ;;  %s950_s7 = smov [#allocation2]  }
  0x2a   : > { %p835_p3 = pneg %p1081_p2  ;;  %p847_p5 = scmp.ne.s32.totalorder %s179_s4, %s846_s6 }
  0x2b   : > { %s851_s10 = sshll.u32 %s950_s7, 4  ;;  %s852_s10 = int_to_ptr.vmem [resolvable:$false] %s851_s10 }
  0x2c   : > { %p849_p7 = pnand %p847_p5, %p835_p3  ;;  %s853_s25 = scalar_lea.vmem %s852_s10, 2048 }
  0x2d   : > { %p854_p4 = scmp.lt.s32.totalorder %s179_s4, %s852_s10  ;;  %p855_p9 = scmp.lt.s32.totalorder %s853_s25, %s846_s6 }
  0x2e   : > { %p850_p6 = pneg %p849_p7 }
  0x2f   : > { %p856_p11 = por %p855_p9, %p854_p4 }
  0x31   : > { %p857_p10 = pnand %p856_p11, %p850_p6 }
  0x33   : > { %860 = shalt.err (!%p857_p10)
}
  0x34   : > { %s951_s8 = smov 64   ;;  %s952_s18 = smov 4  }
  0x35   : > { %729 = dma.hbm_to_vmem [thread:$0]  (!%p1081_p2), %s177_s29, 1024, %s179_s4, %s165_s5, %s951_s8, %s951_s8, %s952_s18  }
  0x36   : > { %190 = sbr.rel (%p1031_p8) target bundleno = 321 (0x141), region = 32  ;;  %s1092_s11 = sand.u32 (!%p1031_p8), 1, %s929_s13  }
  0x37   : > { %s655_s26 = sshll.u32 (!%p1031_p8), %s1092_s11, 6  ;;  %s193_s27 = scalar_lea.sflag (!%p1031_p8), [#allocation3], %s1092_s11 }
  0x38   : > { %s1096_s30 = scalar_lea.vmem (!%p1031_p8), [#allocation2], %s655_s26  ;;  %p1209_p12 = scmp.ne.s32.totalorder (!%p1031_p8), %s1202_s22, 0 }
  0x3b   : > { %912 = dma.done.wait (%p1209_p12), %s193_s27, 1024  }
  0x3c   : > { %914 = vsyncadd (%p1209_p12), %s193_s27, 4294966272 }
  0x3d   : > { %916 = dma.done.wait (%p1011_p1), [#allocation6], 384  }
  0x3e   : > { %918 = vsyncadd (%p1011_p1), [#allocation6], 4294966912  ;;  %v953_v0 = vmov 0   ;;  %v244_v1 = vld [vmem:[#allocation5 + $0x10] sm:$0xff]  ;;  %vm325_vm0 = vcmask 1043456   ;;  %v799_v7 = vld [vmem:[%s1096_s30] sm:$0xff]  }
  0x3f   : > { %364 = vmatprep.mubr.bf16.mxu0 %v953_v0  ;;  %400 = vmatprep.mubr.bf16.mxu1 %v953_v0  ;;  %v669_v2 = vcombine.high %v244_v1, %v244_v1  ;;  %v668_v3 = vcombine.low %v244_v1, %v244_v1  ;;  %v796_v4 = vld [vmem:[#allocation5 + $0x4] ss:$8 sps:$4 sm:$0xff]   ;;  %v798_v6 = vld [vmem:[#allocation5] ss:$8 sps:$4 sm:$0xff]   ;;  %vm300_vm1 = vcmask 195584   ;;  %v803_v11 = vld [vmem:[%s1096_s30 + $0x10] sm:$0xff]  }
  0x40   : > { %v800_v8 = vld [vmem:[%s1096_s30 + $0x20] sm:$0xff]   ;;  %v801_v9 = vld [vmem:[%s1096_s30 + $0x8] sm:$0xff]   ;;  %v804_v12 = vld [vmem:[%s1096_s30 + $0x30] sm:$0xff]   ;;  %vm453_vm2 = vcmask 1046528   ;;  %s657_s24 = sshll.u32 %s1092_s11, 5  ;;  %s686_s4 = sshll.u32 %s937_s15, 9 }
  0x41   : > { %670 = vmatprep.subr.msk.bf16.mxu0 %vm325_vm0, %v669_v2  ;;  %710 = vmatprep.subr.msk.bf16.mxu1 %vm325_vm0, %v669_v2  ;;  %v327_v5 = vsel %vm325_vm0, %v668_v3, 0  ;;  %v802_v10 = vld [vmem:[%s1096_s30 + $0x28] sm:$0xff]   ;;  %v805_v13 = vld [vmem:[%s1096_s30 + $0x18] sm:$0xff]   ;;  %v679_v39 = vld [vmem:[%s1197_s2] ss:$0 sm:$0xff]  ;;  %s1130_s29 = scalar_lea.vmem [#allocation7], %s657_s24  ;;  %s1143_s7 = scalar_lea.hbm %s1198_s3, %s686_s4 }
  0x42   : > { %345 = vmatpush1.bf16.msra.mxu0 %v327_v5  ;;  %712 = vmatpush1.bf16.msra.mxu1 %v327_v5  ;;  %v806_v14 = vld [vmem:[%s1096_s30 + $0x38] sm:$0xff]   ;;  %s549_s21 = sshll.u32 %s1130_s29, 4  ;;  %s534_s15 = scalar_lea.sflag [#allocation4], %s1092_s11  ;;  %s1145_s21 = int_to_ptr.vmem [resolvable:$true] %s549_s21 }
  0x43   : > { %346 = vmatprep.subr.bf16.mxu0 %v796_v4  ;;  %711 = vmatprep.subr.bf16.mxu1 %v796_v4  ;;  %s861_s10 = scalar_lea.vmem %s1145_s21, 512  ;;  %s954_s25 = smov [#allocation7]  }
  0x44   : > { %p862_p1 = scmp.ne.s32.totalorder %s1145_s21, %s861_s10  ;;  %s865_s8 = sshll.u32 %s954_s25, 4  ;;  %s866_s8 = int_to_ptr.vmem [resolvable:$false] %s865_s8 }
  0x45   : > { %s867_s18 = scalar_lea.vmem %s866_s8, 1024  ;;  %p868_p0 = scmp.lt.s32.totalorder %s1145_s21, %s866_s8 }
  0x46   : > { %347 = vmatpush1.bf16.msra.mxu0 %v798_v6  ;;  %713 = vmatpush1.bf16.msra.mxu1 %v798_v6  ;;  %p863_p8 = pnand %p862_p1, %p1064_p13  ;;  %p869_p2 = scmp.lt.s32.totalorder %s867_s18, %s861_s10 }
  0x48   : > { %p864_p10 = pneg %p863_p8  ;;  %p870_p3 = por %p869_p2, %p868_p0 }
  0x49   : > { %671 = vmatmul.mubr.msk.bf16.vlgmr.msra.gmra.mxu0 %vm300_vm1, %v799_v7  ;;  %675 = vmatmul.mubr.msk.bf16.vlgmr.msra.gmra.mxu1 %vm300_vm1, %v800_v8 }
  0x4a   : > { %373 = vmatprep.mubr.bf16.mxu0 %v953_v0  ;;  %409 = vmatprep.mubr.bf16.mxu1 %v953_v0  ;;  %p871_p5 = pnand %p870_p3, %p864_p10 }
  0x51   : > { %672 = vmatmul.mubr.msk.bf16.gmra.mxu0 %vm300_vm1, %v801_v9  ;;  %676 = vmatmul.mubr.msk.bf16.gmra.mxu1 %vm300_vm1, %v802_v10 }
  0x52   : > { %382 = vmatprep.mubr.bf16.mxu0 %v953_v0  ;;  %418 = vmatprep.mubr.bf16.mxu1 %v953_v0 }
  0x59   : > { %673 = vmatmul.mubr.msk.bf16.gmra.mxu0 %vm300_vm1, %v803_v11  ;;  %677 = vmatmul.mubr.msk.bf16.gmra.mxu1 %vm300_vm1, %v804_v12 }
  0x5a   : > { %391 = vmatprep.mubr.bf16.mxu0 %v953_v0  ;;  %427 = vmatprep.mubr.bf16.mxu1 %v953_v0 }
  0x61   : > { %674 = vmatmul.mubr.msk.bf16.gmra.mxu0 %vm300_vm1, %v805_v13  ;;  %678 = vmatmul.mubr.msk.bf16.gmra.mxu1 %vm300_vm1, %v806_v14 }
 0x109   : > { %v366_v15 = vpop.f32.mrf.mxu0  ;;  %v402_v16 = vpop.f32.mrf.mxu1 }
 0x10b   : > { %v368_v17 = vpop.f32.mrf.mxu0  ;;  %v404_v18 = vpop.f32.mrf.mxu1 }
 0x10c   : > { %v454_v27 = vrot.slane %v368_v17, 1  ;;  %v466_v28 = vrot.slane %v404_v18, 1 }
 0x10d   : > { %v370_v19 = vpop.f32.mrf.mxu0  ;;  %v406_v20 = vpop.f32.mrf.mxu1 }
 0x10f   : > { %v371_v21 = vpop.f32.mrf.mxu0  ;;  %v407_v22 = vpop.f32.mrf.mxu1 }
 0x110   : > { %v455_v23 = vrot.slane %v371_v21, 1  ;;  %v467_v24 = vrot.slane %v407_v22, 1 }
 0x111   : > { %v375_v25 = vpop.f32.mrf.mxu0  ;;  %v411_v26 = vpop.f32.mrf.mxu1 }
 0x112   : > { %v456_v31 = vsel %vm453_vm2, %v454_v27, %v455_v23  ;;  %v468_v32 = vsel %vm453_vm2, %v466_v28, %v467_v24 }
 0x113   : > { %v377_v29 = vpop.f32.mrf.mxu0  ;;  %v413_v30 = vpop.f32.mrf.mxu1  ;;  %v486_v35 = vadd.f32 %v456_v31, %v366_v15  ;;  %v490_v36 = vadd.f32 %v468_v32, %v402_v16 }
 0x114   : > { %v457_v40 = vrot.slane %v377_v29, 1  ;;  %v469_v41 = vrot.slane %v413_v30, 1 }
 0x115   : > { %v379_v33 = vpop.f32.mrf.mxu0  ;;  %v415_v34 = vpop.f32.mrf.mxu1  ;;  %v501_v48 = vadd.f32 %v679_v39, %v486_v35  ;;  %v505_v49 = vadd.f32 %v679_v39, %v490_v36 }
 0x117   : > { %v380_v37 = vpop.f32.mrf.mxu0  ;;  %v416_v38 = vpop.f32.mrf.mxu1  ;;  %v509_v58 = vmax.f32 %v501_v48, 0.0  ;;  %v513_v59 = vmax.f32 %v505_v49, 0.0 }
 0x118   : > { %v458_v42 = vrot.slane %v380_v37, 1  ;;  %v470_v43 = vrot.slane %v416_v38, 1 }
 0x119   : > { %v384_v44 = vpop.f32.mrf.mxu0  ;;  %v420_v45 = vpop.f32.mrf.mxu1 }
 0x11a   : > { %v459_v46 = vsel %vm453_vm2, %v457_v40, %v458_v42  ;;  %v471_v47 = vsel %vm453_vm2, %v469_v41, %v470_v43 }
 0x11b   : > { %v487_v50 = vadd.f32 %v459_v46, %v375_v25  ;;  %v491_v51 = vadd.f32 %v471_v47, %v411_v26  ;;  %v386_v52 = vpop.f32.mrf.mxu0  ;;  %v422_v53 = vpop.f32.mrf.mxu1 }
 0x11c   : > { %v460_v6 = vrot.slane %v386_v52, 1  ;;  %v472_v7 = vrot.slane %v422_v53, 1 }
 0x11d   : > { %v502_v54 = vadd.f32 %v679_v39, %v487_v50  ;;  %v506_v55 = vadd.f32 %v679_v39, %v491_v51  ;;  %v388_v56 = vpop.f32.mrf.mxu0  ;;  %v424_v57 = vpop.f32.mrf.mxu1 }
 0x11f   : > { %v510_v60 = vmax.f32 %v502_v54, 0.0  ;;  %v514_v61 = vmax.f32 %v506_v55, 0.0  ;;  %v389_v62 = vpop.f32.mrf.mxu0  ;;  %v425_v63 = vpop.f32.mrf.mxu1 }
 0x120   : > { %v461_v0 = vrot.slane %v389_v62, 1  ;;  %v473_v1 = vrot.slane %v425_v63, 1 }
 0x121   : > { %v690_v2 = vpack.c.bf16 %v510_v60, %v509_v58  ;;  %v700_v3 = vpack.c.bf16 %v514_v61, %v513_v59  ;;  %v393_v4 = vpop.f32.mrf.mxu0  ;;  %v429_v5 = vpop.f32.mrf.mxu1 }
 0x122   : > { %v462_v10 = vsel %vm453_vm2, %v460_v6, %v461_v0  ;;  %v474_v11 = vsel %vm453_vm2, %v472_v7, %v473_v1 }
 0x123   : > { %691 = vst [vmem:[%s1130_s29] sm:$0xff] %v690_v2   ;;  %708 = vst [vmem:[%s1130_s29 + $0x10] sm:$0xff] %v700_v3   ;;  %v395_v8 = vpop.f32.mrf.mxu0  ;;  %v431_v9 = vpop.f32.mrf.mxu1  ;;  %v488_v14 = vadd.f32 %v462_v10, %v384_v44  ;;  %v492_v15 = vadd.f32 %v474_v11, %v420_v45 }
 0x124   : > { %v463_v18 = vrot.slane %v395_v8, 1  ;;  %v475_v19 = vrot.slane %v431_v9, 1 }
 0x125   : > { %v397_v12 = vpop.f32.mrf.mxu0  ;;  %v433_v13 = vpop.f32.mrf.mxu1  ;;  %v503_v24 = vadd.f32 %v679_v39, %v488_v14  ;;  %v507_v25 = vadd.f32 %v679_v39, %v492_v15 }
 0x127   : > { %v398_v16 = vpop.f32.mrf.mxu0  ;;  %v434_v17 = vpop.f32.mrf.mxu1  ;;  %v511_v30 = vmax.f32 %v503_v24, 0.0  ;;  %v515_v31 = vmax.f32 %v507_v25, 0.0 }
 0x128   : > { %v464_v20 = vrot.slane %v398_v16, 1  ;;  %v476_v21 = vrot.slane %v434_v17, 1 }
 0x12a   : > { %v465_v22 = vsel %vm453_vm2, %v463_v18, %v464_v20  ;;  %v477_v23 = vsel %vm453_vm2, %v475_v19, %v476_v21 }
 0x12b   : > { %v489_v26 = vadd.f32 %v465_v22, %v393_v4  ;;  %v493_v27 = vadd.f32 %v477_v23, %v429_v5 }
 0x12d   : > { %v504_v28 = vadd.f32 %v679_v39, %v489_v26  ;;  %v508_v29 = vadd.f32 %v679_v39, %v493_v27 }
 0x12f   : > { %v512_v32 = vmax.f32 %v504_v28, 0.0  ;;  %v516_v33 = vmax.f32 %v508_v29, 0.0 }
 0x131   : > { %v695_v34 = vpack.c.bf16 %v512_v32, %v511_v30  ;;  %v705_v35 = vpack.c.bf16 %v516_v33, %v515_v31 }
 0x133   : > { %707 = vst [vmem:[%s1130_s29 + $0x8] sm:$0xff] %v695_v34   ;;  %709 = vst [vmem:[%s1130_s29 + $0x18] sm:$0xff] %v705_v35  }
 0x134   : > { %874 = shalt.err (!%p871_p5)
}
 0x135   : > { %s875_s26 = scalar_lea.hbm %s1143_s7, 512  ;;  %s879_s20 = scalar_lea.hbm %s1198_s3, 1024 }
 0x136   : > { %p876_p7 = scmp.ne.s32.totalorder %s1143_s7, %s875_s26  ;;  %p880_p9 = scmp.lt.s32.totalorder %s1143_s7, %s1198_s3 }
 0x137   : > { %p881_p11 = scmp.lt.s32.totalorder %s879_s20, %s875_s26 }
 0x138   : > { %p877_p6 = pnand %p876_p7, %p1064_p13 }
 0x139   : > { %p882_p12 = por %p881_p11, %p880_p9 }
 0x13a   : > { %p878_p4 = pneg %p877_p6 }
 0x13c   : > { %p883_p1 = pnand %p882_p12, %p878_p4 }
 0x13e   : > { %886 = shalt.err (!%p883_p1)
}
 0x13f   : > { %s955_s29 = smov 64   ;;  %s956_s4 = smov 4  }
 0x140   : > { %720 = dma.vmem_to_hbm [thread:$0]  (%p1064_p13), %s1145_s21, 512, %s1143_s7, %s534_s15, %s955_s29, %s955_s29, %s956_s4  }
 0x141 PF: > { %s564_s5 = sand.u32 1, %s925_s12   ;;  %p1210_p8 = scmp.ne.s32.totalorder %s1203_s23, 0 }
 0x142   : > { %p1211_p10 = scmp.ge.s32.totalorder %s945_s17, 2  ;;  %s565_s6 = scalar_lea.sflag [#allocation4], %s564_s5 }
 0x144   : > { %p731_p0 = pnand %p1211_p10, %p1210_p8 }
 0x146   : > { %p732_p2 = pneg %p731_p0 }
 0x148   : > { %920 = dma.done.wait (%p732_p2), %s565_s6, 512  }
 0x149   : > { %922 = vsyncadd (%p732_p2), %s565_s6, 4294966784  ;;  %s20_s17 = sadd.s32 1, %s945_s17   ;;  %s1212_s12 = smov %s929_s13 }
 0x14a   : > { %p17_p3 = scmp.ge.s32.totalorder %s20_s17, 4   ;;  %s1213_s13 = smov %s933_s14 }
 0x14b   : > { %s1214_s14 = smov %s1073_s19  ;;  %s1215_s15 = smov %s941_s16 }
 0x14c   : > { %s1216_s16 = smov %s1218_s28  ;;  %19 = sbr.rel (!%p17_p3) target bundleno = 7 (0x7), region = 81 }
 0x151   :  { %570 = vsyncpa [#allocation3], 1 }
 0x152   :  { %572 = vsyncpa [#allocation3 + $0x1], 1 }
 0x153   :  { %573 = vsyncpa [#allocation6], 1 }
 0x154   :  { %574 = vsyncpa [#allocation4], 1 }
 0x155   :  { %576 = vsyncpa [#allocation4 + $0x1], 1 }

// kernel: tpu_custom_call.1
= control target key start
LH: loop header
LB: loop body
LE: loop exit
PB: predicated region body
PF: predicated region fallthrough
CT: control target
= control target key end

     0   :  { %8 = vsyncpa [#allocation3], 0  ;;  %s1195_s0 = inlined_call_operand.hbm [shape: bf16[2,8,16,24], index: 0, kind: input, shape index: {}]   ;;  %s1196_s1 = inlined_call_operand.hbm [shape: bf16[24,256], index: 1, kind: input, shape index: {}]   ;;  %s1197_s2 = inlined_call_operand.vmem [shape: f32[1,128], index: 2, kind: input, shape index: {}]   ;;  %s1198_s3 = inlined_call_operand.hbm [shape: bf16[2,8,8,128], index: 3, kind: output, shape index: {}]  }
   0x1   :  { %10 = vsyncpa [#allocation3 + $0x1], 0 }
   0x2   :  { %11 = vsyncpa [#allocation6], 0 }
   0x3   :  { %12 = vsyncpa [#allocation4], 0 }
   0x4   :  { %14 = vsyncpa [#allocation4 + $0x1], 0  ;;  %s977_s12 = smov 0   ;;  %s979_s13 = smov 0  }
   0x5   :  { %s981_s14 = smov 0   ;;  %s983_s15 = smov 0  }
   0x6   :  { %s985_s16 = smov 0   ;;  %s987_s17 = smov 0  }
   0x7 LB: > { %s646_s18 = sadd.s32 4294967295, %s945_s17   ;;  %s647_s19 = sadd.s32 4294967294, %s945_s17   ;;  %s945_s17 = sphi %s987_s17, %s20_s17   ;;  %s941_s16 = sphi %s985_s16, %s1216_s16   ;;  %s937_s15 = sphi %s983_s15, %s1215_s15   ;;  %s933_s14 = sphi %s981_s14, %s1214_s14   ;;  %s929_s13 = sphi %s979_s13, %s1213_s13   ;;  %s925_s12 = sphi %s977_s12, %s1212_s12  }
   0x8   : > { %p54_p0 = scmp.ne.s32.totalorder %s929_s13, %s925_s12  ;;  %p1011_p1 = scmp.eq.s32.totalorder %s646_s18, 0 }
   0x9   : > { %p1015_p2 = scmp.eq.s32.totalorder %s646_s18, 1  ;;  %p128_p3 = scmp.eq.s32.totalorder %s647_s19, 1 }
   0xa   : > { %p1021_p4 = por %p1011_p1, %p54_p0  ;;  %p648_p5 = scmp.ge.s32.totalorder %s945_s17, 1 }
   0xb   : > { %p1026_p6 = por %p128_p3, %p54_p0  ;;  %p135_p7 = scmp.lt.s32.totalorder %s945_s17, 3 }
   0xc   : > { %s1202_s22 = scalar_select %p1021_p4, 1, 0 }
   0xd   : > { %s1203_s23 = scalar_select %p1026_p6, 1, 0 }
   0xe   : > { %p1031_p8 = pnand %p648_p5, %p135_p7  ;;  %s947_s25 = smov [#allocation5]  }
   0xf   : > { %s147_s26 = sshll.u32 %s947_s25, 4  ;;  %s32_s28 = sadd.s32 1, %s941_s16  ;;  %s148_s26 = int_to_ptr.vmem [resolvable:$true] %s147_s26 }
  0x10   : > { %p722_p9 = pneg %p1031_p8  ;;  %s818_s29 = scalar_lea.vmem %s148_s26, 384 }
  0x11   : > { %p819_p13 = scmp.ne.s32.totalorder %s148_s26, %s818_s29  ;;  %p826_p5 = scmp.lt.s32.totalorder %s148_s26, %s148_s26 }
  0x12   : > { %p1040_p11 = pnand %p722_p9, %p1011_p1  ;;  %p827_p7 = scmp.lt.s32.totalorder %s818_s29, %s818_s29 }
  0x14   : > { %p809_p12 = pneg %p1040_p11  ;;  %p828_p6 = por %p827_p7, %p826_p5 }
  0x16   : > { %p821_p0 = pnand %p819_p13, %p809_p12 }
  0x18   : > { %p822_p3 = pneg %p821_p0 }
  0x1a   : > { %p829_p4 = pnand %p828_p6, %p822_p3 }
  0x1c   : > { %832 = shalt.err (!%p829_p4)
}
  0x1d   : > { %s948_s30 = smov 128   ;;  %s949_s4 = smov 8  }
  0x1e   : > { %725 = dma.hbm_to_vmem [thread:$0]  (!%p1040_p11), %s1196_s1, 384, %s148_s26, [#allocation6], %s948_s30, %s948_s30, %s949_s4  }
  0x1f   : > { %p34_p6 = scmp.ge.s32.totalorder %s32_s28, 2  ;;  %s41_s7 = sadd.s32 1, %s933_s14 }
  0x20   : > { %p48_p4 = scmp.ne.s32.totalorder %s933_s14, %s929_s13  ;;  %p49_p9 = scmp.eq.s32.totalorder %s945_s17, 0 }
  0x21   : > { %s1218_s28 = smov (%p34_p6, %s32_s28), 0  ;;  %p735_p0 = scmp.lt.s32.totalorder %s945_s17, 2 }
  0x22   : > { %p1058_p12 = por %p49_p9, %p48_p4  ;;  %p1064_p13 = por %p1015_p2, %p48_p4 }
  0x23   : > { %s36_s10 = ssub.s32 %s941_s16, %s1218_s28  ;;  %s164_s11 = sand.u32 1, %s933_s14  }
  0x24   : > { %p39_p11 = scmp.eq.s32.totalorder %s36_s10, 0  ;;  %s651_s18 = sshll.u32 %s164_s11, 6 }
  0x25   : > { %s685_s25 = sshll.u32 %s941_s16, 10  ;;  %s168_s30 = scalar_lea.vmem [#allocation2], %s651_s18 }
  0x26   : > { %s1073_s19 = scalar_select %p39_p11, %s933_s14, %s41_s7  }
  0x27   : > { %s177_s29 = scalar_lea.hbm %s1195_s0, %s685_s25  ;;  %s178_s4 = sshll.u32 %s168_s30, 4  ;;  %s179_s4 = int_to_ptr.vmem [resolvable:$true] %s178_s4 }
  0x28   : > { %p1081_p2 = pnand %p735_p0, %p1058_p12  ;;  %s165_s5 = scalar_lea.sflag [#allocation3], %s164_s11 }
  0x29   : > { %s846_s6 = scalar_lea.vmem %s179_s4, 1024  ;;  %s950_s7 = smov [#allocation2]  }
  0x2a   : > { %p835_p3 = pneg %p1081_p2  ;;  %p847_p5 = scmp.ne.s32.totalorder %s179_s4, %s846_s6 }
  0x2b   : > { %s851_s10 = sshll.u32 %s950_s7, 4  ;;  %s852_s10 = int_to_ptr.vmem [resolvable:$false] %s851_s10 }
  0x2c   : > { %p849_p7 = pnand %p847_p5, %p835_p3  ;;  %s853_s25 = scalar_lea.vmem %s852_s10, 2048 }
  0x2d   : > { %p854_p4 = scmp.lt.s32.totalorder %s179_s4, %s852_s10  ;;  %p855_p9 = scmp.lt.s32.totalorder %s853_s25, %s846_s6 }
  0x2e   : > { %p850_p6 = pneg %p849_p7 }
  0x2f   : > { %p856_p11 = por %p855_p9, %p854_p4 }
  0x31   : > { %p857_p10 = pnand %p856_p11, %p850_p6 }
  0x33   : > { %860 = shalt.err (!%p857_p10)
}
  0x34   : > { %s951_s8 = smov 64   ;;  %s952_s18 = smov 4  }
  0x35   : > { %729 = dma.hbm_to_vmem [thread:$0]  (!%p1081_p2), %s177_s29, 1024, %s179_s4, %s165_s5, %s951_s8, %s951_s8, %s952_s18  }
  0x36   : > { %190 = sbr.rel (%p1031_p8) target bundleno = 321 (0x141), region = 32  ;;  %s1092_s11 = sand.u32 (!%p1031_p8), 1, %s929_s13  }
  0x37   : > { %s655_s26 = sshll.u32 (!%p1031_p8), %s1092_s11, 6  ;;  %s193_s27 = scalar_lea.sflag (!%p1031_p8), [#allocation3], %s1092_s11 }
  0x38   : > { %s1096_s30 = scalar_lea.vmem (!%p1031_p8), [#allocation2], %s655_s26  ;;  %p1209_p12 = scmp.ne.s32.totalorder (!%p1031_p8), %s1202_s22, 0 }
  0x3b   : > { %912 = dma.done.wait (%p1209_p12), %s193_s27, 1024  }
  0x3c   : > { %914 = vsyncadd (%p1209_p12), %s193_s27, 4294966272 }
  0x3d   : > { %916 = dma.done.wait (%p1011_p1), [#allocation6], 384  }
  0x3e   : > { %918 = vsyncadd (%p1011_p1), [#allocation6], 4294966912  ;;  %v953_v0 = vmov 0   ;;  %v244_v1 = vld [vmem:[#allocation5 + $0x10] sm:$0xff]  ;;  %vm325_vm0 = vcmask 1043456   ;;  %v799_v7 = vld [vmem:[%s1096_s30] sm:$0xff]  }
  0x3f   : > { %364 = vmatprep.mubr.bf16.mxu0 %v953_v0  ;;  %400 = vmatprep.mubr.bf16.mxu1 %v953_v0  ;;  %v669_v2 = vcombine.high %v244_v1, %v244_v1  ;;  %v668_v3 = vcombine.low %v244_v1, %v244_v1  ;;  %v796_v4 = vld [vmem:[#allocation5 + $0x4] ss:$8 sps:$4 sm:$0xff]   ;;  %v798_v6 = vld [vmem:[#allocation5] ss:$8 sps:$4 sm:$0xff]   ;;  %vm300_vm1 = vcmask 195584   ;;  %v803_v11 = vld [vmem:[%s1096_s30 + $0x10] sm:$0xff]  }
  0x40   : > { %v800_v8 = vld [vmem:[%s1096_s30 + $0x20] sm:$0xff]   ;;  %v801_v9 = vld [vmem:[%s1096_s30 + $0x8] sm:$0xff]   ;;  %v804_v12 = vld [vmem:[%s1096_s30 + $0x30] sm:$0xff]   ;;  %vm453_vm2 = vcmask 1046528   ;;  %s657_s24 = sshll.u32 %s1092_s11, 5  ;;  %s686_s4 = sshll.u32 %s937_s15, 9 }
  0x41   : > { %670 = vmatprep.subr.msk.bf16.mxu0 %vm325_vm0, %v669_v2  ;;  %710 = vmatprep.subr.msk.bf16.mxu1 %vm325_vm0, %v669_v2  ;;  %v327_v5 = vsel %vm325_vm0, %v668_v3, 0  ;;  %v802_v10 = vld [vmem:[%s1096_s30 + $0x28] sm:$0xff]   ;;  %v805_v13 = vld [vmem:[%s1096_s30 + $0x18] sm:$0xff]   ;;  %v679_v39 = vld [vmem:[%s1197_s2] ss:$0 sm:$0xff]  ;;  %s1130_s29 = scalar_lea.vmem [#allocation7], %s657_s24  ;;  %s1143_s7 = scalar_lea.hbm %s1198_s3, %s686_s4 }
  0x42   : > { %345 = vmatpush1.bf16.msra.mxu0 %v327_v5  ;;  %712 = vmatpush1.bf16.msra.mxu1 %v327_v5  ;;  %v806_v14 = vld [vmem:[%s1096_s30 + $0x38] sm:$0xff]   ;;  %s549_s21 = sshll.u32 %s1130_s29, 4  ;;  %s534_s15 = scalar_lea.sflag [#allocation4], %s1092_s11  ;;  %s1145_s21 = int_to_ptr.vmem [resolvable:$true] %s549_s21 }
  0x43   : > { %346 = vmatprep.subr.bf16.mxu0 %v796_v4  ;;  %711 = vmatprep.subr.bf16.mxu1 %v796_v4  ;;  %s861_s10 = scalar_lea.vmem %s1145_s21, 512  ;;  %s954_s25 = smov [#allocation7]  }
  0x44   : > { %p862_p1 = scmp.ne.s32.totalorder %s1145_s21, %s861_s10  ;;  %s865_s8 = sshll.u32 %s954_s25, 4  ;;  %s866_s8 = int_to_ptr.vmem [resolvable:$false] %s865_s8 }
  0x45   : > { %s867_s18 = scalar_lea.vmem %s866_s8, 1024  ;;  %p868_p0 = scmp.lt.s32.totalorder %s1145_s21, %s866_s8 }
  0x46   : > { %347 = vmatpush1.bf16.msra.mxu0 %v798_v6  ;;  %713 = vmatpush1.bf16.msra.mxu1 %v798_v6  ;;  %p863_p8 = pnand %p862_p1, %p1064_p13  ;;  %p869_p2 = scmp.lt.s32.totalorder %s867_s18, %s861_s10 }
  0x48   : > { %p864_p10 = pneg %p863_p8  ;;  %p870_p3 = por %p869_p2, %p868_p0 }
  0x49   : > { %671 = vmatmul.mubr.msk.bf16.vlgmr.msra.gmra.mxu0 %vm300_vm1, %v799_v7  ;;  %675 = vmatmul.mubr.msk.bf16.vlgmr.msra.gmra.mxu1 %vm300_vm1, %v800_v8 }
  0x4a   : > { %373 = vmatprep.mubr.bf16.mxu0 %v953_v0  ;;  %409 = vmatprep.mubr.bf16.mxu1 %v953_v0  ;;  %p871_p5 = pnand %p870_p3, %p864_p10 }
  0x51   : > { %672 = vmatmul.mubr.msk.bf16.gmra.mxu0 %vm300_vm1, %v801_v9  ;;  %676 = vmatmul.mubr.msk.bf16.gmra.mxu1 %vm300_vm1, %v802_v10 }
  0x52   : > { %382 = vmatprep.mubr.bf16.mxu0 %v953_v0  ;;  %418 = vmatprep.mubr.bf16.mxu1 %v953_v0 }
  0x59   : > { %673 = vmatmul.mubr.msk.bf16.gmra.mxu0 %vm300_vm1, %v803_v11  ;;  %677 = vmatmul.mubr.msk.bf16.gmra.mxu1 %vm300_vm1, %v804_v12 }
  0x5a   : > { %391 = vmatprep.mubr.bf16.mxu0 %v953_v0  ;;  %427 = vmatprep.mubr.bf16.mxu1 %v953_v0 }
  0x61   : > { %674 = vmatmul.mubr.msk.bf16.gmra.mxu0 %vm300_vm1, %v805_v13  ;;  %678 = vmatmul.mubr.msk.bf16.gmra.mxu1 %vm300_vm1, %v806_v14 }
 0x109   : > { %v366_v15 = vpop.f32.mrf.mxu0  ;;  %v402_v16 = vpop.f32.mrf.mxu1 }
 0x10b   : > { %v368_v17 = vpop.f32.mrf.mxu0  ;;  %v404_v18 = vpop.f32.mrf.mxu1 }
 0x10c   : > { %v454_v27 = vrot.slane %v368_v17, 1  ;;  %v466_v28 = vrot.slane %v404_v18, 1 }
 0x10d   : > { %v370_v19 = vpop.f32.mrf.mxu0  ;;  %v406_v20 = vpop.f32.mrf.mxu1 }
 0x10f   : > { %v371_v21 = vpop.f32.mrf.mxu0  ;;  %v407_v22 = vpop.f32.mrf.mxu1 }
 0x110   : > { %v455_v23 = vrot.slane %v371_v21, 1  ;;  %v467_v24 = vrot.slane %v407_v22, 1 }
 0x111   : > { %v375_v25 = vpop.f32.mrf.mxu0  ;;  %v411_v26 = vpop.f32.mrf.mxu1 }
 0x112   : > { %v456_v31 = vsel %vm453_vm2, %v454_v27, %v455_v23  ;;  %v468_v32 = vsel %vm453_vm2, %v466_v28, %v467_v24 }
 0x113   : > { %v377_v29 = vpop.f32.mrf.mxu0  ;;  %v413_v30 = vpop.f32.mrf.mxu1  ;;  %v486_v35 = vadd.f32 %v456_v31, %v366_v15  ;;  %v490_v36 = vadd.f32 %v468_v32, %v402_v16 }
 0x114   : > { %v457_v40 = vrot.slane %v377_v29, 1  ;;  %v469_v41 = vrot.slane %v413_v30, 1 }
 0x115   : > { %v379_v33 = vpop.f32.mrf.mxu0  ;;  %v415_v34 = vpop.f32.mrf.mxu1  ;;  %v501_v48 = vadd.f32 %v679_v39, %v486_v35  ;;  %v505_v49 = vadd.f32 %v679_v39, %v490_v36 }
 0x117   : > { %v380_v37 = vpop.f32.mrf.mxu0  ;;  %v416_v38 = vpop.f32.mrf.mxu1  ;;  %v509_v58 = vmax.f32 %v501_v48, 0.0  ;;  %v513_v59 = vmax.f32 %v505_v49, 0.0 }
 0x118   : > { %v458_v42 = vrot.slane %v380_v37, 1  ;;  %v470_v43 = vrot.slane %v416_v38, 1 }
 0x119   : > { %v384_v44 = vpop.f32.mrf.mxu0  ;;  %v420_v45 = vpop.f32.mrf.mxu1 }
 0x11a   : > { %v459_v46 = vsel %vm453_vm2, %v457_v40, %v458_v42  ;;  %v471_v47 = vsel %vm453_vm2, %v469_v41, %v470_v43 }
 0x11b   : > { %v487_v50 = vadd.f32 %v459_v46, %v375_v25  ;;  %v491_v51 = vadd.f32 %v471_v47, %v411_v26  ;;  %v386_v52 = vpop.f32.mrf.mxu0  ;;  %v422_v53 = vpop.f32.mrf.mxu1 }
 0x11c   : > { %v460_v6 = vrot.slane %v386_v52, 1  ;;  %v472_v7 = vrot.slane %v422_v53, 1 }
 0x11d   : > { %v502_v54 = vadd.f32 %v679_v39, %v487_v50  ;;  %v506_v55 = vadd.f32 %v679_v39, %v491_v51  ;;  %v388_v56 = vpop.f32.mrf.mxu0  ;;  %v424_v57 = vpop.f32.mrf.mxu1 }
 0x11f   : > { %v510_v60 = vmax.f32 %v502_v54, 0.0  ;;  %v514_v61 = vmax.f32 %v506_v55, 0.0  ;;  %v389_v62 = vpop.f32.mrf.mxu0  ;;  %v425_v63 = vpop.f32.mrf.mxu1 }
 0x120   : > { %v461_v0 = vrot.slane %v389_v62, 1  ;;  %v473_v1 = vrot.slane %v425_v63, 1 }
 0x121   : > { %v690_v2 = vpack.c.bf16 %v510_v60, %v509_v58  ;;  %v700_v3 = vpack.c.bf16 %v514_v61, %v513_v59  ;;  %v393_v4 = vpop.f32.mrf.mxu0  ;;  %v429_v5 = vpop.f32.mrf.mxu1 }
 0x122   : > { %v462_v10 = vsel %vm453_vm2, %v460_v6, %v461_v0  ;;  %v474_v11 = vsel %vm453_vm2, %v472_v7, %v473_v1 }
 0x123   : > { %691 = vst [vmem:[%s1130_s29] sm:$0xff] %v690_v2   ;;  %708 = vst [vmem:[%s1130_s29 + $0x10] sm:$0xff] %v700_v3   ;;  %v395_v8 = vpop.f32.mrf.mxu0  ;;  %v431_v9 = vpop.f32.mrf.mxu1  ;;  %v488_v14 = vadd.f32 %v462_v10, %v384_v44  ;;  %v492_v15 = vadd.f32 %v474_v11, %v420_v45 }
 0x124   : > { %v463_v18 = vrot.slane %v395_v8, 1  ;;  %v475_v19 = vrot.slane %v431_v9, 1 }
 0x125   : > { %v397_v12 = vpop.f32.mrf.mxu0  ;;  %v433_v13 = vpop.f32.mrf.mxu1  ;;  %v503_v24 = vadd.f32 %v679_v39, %v488_v14  ;;  %v507_v25 = vadd.f32 %v679_v39, %v492_v15 }
 0x127   : > { %v398_v16 = vpop.f32.mrf.mxu0  ;;  %v434_v17 = vpop.f32.mrf.mxu1  ;;  %v511_v30 = vmax.f32 %v503_v24, 0.0  ;;  %v515_v31 = vmax.f32 %v507_v25, 0.0 }
 0x128   : > { %v464_v20 = vrot.slane %v398_v16, 1  ;;  %v476_v21 = vrot.slane %v434_v17, 1 }
 0x12a   : > { %v465_v22 = vsel %vm453_vm2, %v463_v18, %v464_v20  ;;  %v477_v23 = vsel %vm453_vm2, %v475_v19, %v476_v21 }
 0x12b   : > { %v489_v26 = vadd.f32 %v465_v22, %v393_v4  ;;  %v493_v27 = vadd.f32 %v477_v23, %v429_v5 }
 0x12d   : > { %v504_v28 = vadd.f32 %v679_v39, %v489_v26  ;;  %v508_v29 = vadd.f32 %v679_v39, %v493_v27 }
 0x12f   : > { %v512_v32 = vmax.f32 %v504_v28, 0.0  ;;  %v516_v33 = vmax.f32 %v508_v29, 0.0 }
 0x131   : > { %v695_v34 = vpack.c.bf16 %v512_v32, %v511_v30  ;;  %v705_v35 = vpack.c.bf16 %v516_v33, %v515_v31 }
 0x133   : > { %707 = vst [vmem:[%s1130_s29 + $0x8] sm:$0xff] %v695_v34   ;;  %709 = vst [vmem:[%s1130_s29 + $0x18] sm:$0xff] %v705_v35  }
 0x134   : > { %874 = shalt.err (!%p871_p5)
}
 0x135   : > { %s875_s26 = scalar_lea.hbm %s1143_s7, 512  ;;  %s879_s20 = scalar_lea.hbm %s1198_s3, 1024 }
 0x136   : > { %p876_p7 = scmp.ne.s32.totalorder %s1143_s7, %s875_s26  ;;  %p880_p9 = scmp.lt.s32.totalorder %s1143_s7, %s1198_s3 }
 0x137   : > { %p881_p11 = scmp.lt.s32.totalorder %s879_s20, %s875_s26 }
 0x138   : > { %p877_p6 = pnand %p876_p7, %p1064_p13 }
 0x139   : > { %p882_p12 = por %p881_p11, %p880_p9 }
 0x13a   : > { %p878_p4 = pneg %p877_p6 }
 0x13c   : > { %p883_p1 = pnand %p882_p12, %p878_p4 }
 0x13e   : > { %886 = shalt.err (!%p883_p1)
}
 0x13f   : > { %s955_s29 = smov 64   ;;  %s956_s4 = smov 4  }
 0x140   : > { %720 = dma.vmem_to_hbm [thread:$0]  (%p1064_p13), %s1145_s21, 512, %s1143_s7, %s534_s15, %s955_s29, %s955_s29, %s956_s4  }
 0x141 PF: > { %s564_s5 = sand.u32 1, %s925_s12   ;;  %p1210_p8 = scmp.ne.s32.totalorder %s1203_s23, 0 }
 0x142   : > { %p1211_p10 = scmp.ge.s32.totalorder %s945_s17, 2  ;;  %s565_s6 = scalar_lea.sflag [#allocation4], %s564_s5 }
 0x144   : > { %p731_p0 = pnand %p1211_p10, %p1210_p8 }
 0x146   : > { %p732_p2 = pneg %p731_p0 }
 0x148   : > { %920 = dma.done.wait (%p732_p2), %s565_s6, 512  }
 0x149   : > { %922 = vsyncadd (%p732_p2), %s565_s6, 4294966784  ;;  %s20_s17 = sadd.s32 1, %s945_s17   ;;  %s1212_s12 = smov %s929_s13 }
 0x14a   : > { %p17_p3 = scmp.ge.s32.totalorder %s20_s17, 4   ;;  %s1213_s13 = smov %s933_s14 }
 0x14b   : > { %s1214_s14 = smov %s1073_s19  ;;  %s1215_s15 = smov %s941_s16 }
 0x14c   : > { %s1216_s16 = smov %s1218_s28  ;;  %19 = sbr.rel (!%p17_p3) target bundleno = 7 (0x7), region = 81 }
 0x151   :  { %570 = vsyncpa [#allocation3], 1 }
 0x152   :  { %572 = vsyncpa [#allocation3 + $0x1], 1 }
 0x153   :  { %573 = vsyncpa [#allocation6], 1 }
 0x154   :  { %574 = vsyncpa [#allocation4], 1 }
 0x155   :  { %576 = vsyncpa [#allocation4 + $0x1], 1 }

</bundles_post_ra>
